<compile_context>
chip_gen: v5e
topology: v5e:2x2
jax: 0.10.0
libtpu: 0.0.40
codegen_flags: <defaults>
</compile_context>

<pallas_src>
import functools

import jax
import jax.numpy as jnp
from jax.experimental import pallas as pl
from jax.experimental.pallas import tpu as pltpu


def _round_up(x, m):
    return ((x + m - 1) // m) * m


def _mlp_kernel(x_ref, w_ref, b_ref, o_ref, acc_ref):
    """Computes one (tm, tn) tile of relu(x @ W_t + b); K streamed on grid axis 2."""
    k = pl.program_id(2)

    @pl.when(k == 0)
    def _():
        acc_ref[...] = jnp.zeros_like(acc_ref)

    # MXU matmul, f32 accumulation.
    acc_ref[...] += jnp.dot(x_ref[...], w_ref[...],
                            preferred_element_type=jnp.float32)

    @pl.when(k == pl.num_programs(2) - 1)
    def _():
        # Fused epilogue: bias add + ReLU + single store (no intermediate y tile).
        y = acc_ref[...] + b_ref[...].astype(jnp.float32)   # (tm, tn) + (1, tn)
        o_ref[...] = jnp.maximum(y, 0.0).astype(o_ref.dtype)


def prepare_mlp_params(weight, bias, compute_dtype=jnp.bfloat16):
    """Done ONCE at parameter-load time (hoisted out of the per-forward path):
    transpose PyTorch-layout weight (D_hidden, D_in) -> (D_in, D_hidden) and cast."""
    w_t = jnp.asarray(weight).T.astype(compute_dtype)            # (D_in, D_hidden)
    b2 = jnp.asarray(bias).reshape(1, -1).astype(jnp.float32)    # (1, D_hidden)
    return w_t, b2


@functools.partial(jax.jit, static_argnames=("tm", "tn", "tk"))
def mlp_forward(x, w_t, b2, *, tm=256, tn=256, tk=512):
    """Pallas equivalent of F.relu(torch.nn.Linear(D_in, D_hidden)(x)).

    x:   (B, D_in)         float32 (cast to bf16 internally)
    w_t: (D_in, D_hidden)  bf16, pre-transposed via prepare_mlp_params
    b2:  (1, D_hidden)     float32
    returns (B, D_hidden)  float32
    """
    B, D_in = x.shape
    d_in_w, D_hidden = w_t.shape
    assert d_in_w == D_in

    compute_dtype = w_t.dtype
    x = x.astype(compute_dtype)

    # Clamp tile sizes to the (aligned) problem size; keep (8, 128) layout alignment.
    tm = min(tm, _round_up(B, 8))
    tk = min(tk, _round_up(D_in, 128))
    tn = min(tn, _round_up(D_hidden, 128))

    Bp = _round_up(B, tm)
    Kp = _round_up(D_in, tk)
    Np = _round_up(D_hidden, tn)

    # Zero padding is semantics-preserving: extra K contributes 0 to the dot,
    # extra N columns are sliced off below.
    if (Bp, Kp) != (B, D_in):
        x = jnp.pad(x, ((0, Bp - B), (0, Kp - D_in)))
    if (Kp, Np) != (D_in, D_hidden):
        w_t = jnp.pad(w_t, ((0, Kp - D_in), (0, Np - D_hidden)))
    if Np != D_hidden:
        b2 = jnp.pad(b2, ((0, 0), (0, Np - D_hidden)))

    grid = (Bp // tm, Np // tn, Kp // tk)

    itemsize = jnp.dtype(compute_dtype).itemsize
    cost = pl.CostEstimate(
        flops=2 * Bp * Kp * Np,
        transcendentals=0,
        bytes_accessed=(Bp * Kp * itemsize      # x
                        + Kp * Np * itemsize    # W
                        + Np * 4                # bias
                        + Bp * Np * 4),         # y
    )

    out = pl.pallas_call(
        _mlp_kernel,
        out_shape=jax.ShapeDtypeStruct((Bp, Np), jnp.float32),
        grid_spec=pltpu.PrefetchScalarGridSpec(
            num_scalar_prefetch=0,
            grid=grid,
            in_specs=[
                pl.BlockSpec((tm, tk), lambda i, j, k: (i, k)),   # x tile
                pl.BlockSpec((tk, tn), lambda i, j, k: (k, j)),   # W_t tile
                pl.BlockSpec((1, tn), lambda i, j, k: (0, j)),    # bias tile
            ],
            out_specs=pl.BlockSpec((tm, tn), lambda i, j, k: (i, j)),
            scratch_shapes=[pltpu.VMEM((tm, tn), jnp.float32)],
        ),
        compiler_params=pltpu.CompilerParams(
            dimension_semantics=("parallel", "parallel", "arbitrary"),
        ),
        cost_estimate=cost,
    )(x, w_t, b2)

    return out[:B, :D_hidden]


if __name__ == "__main__":
    # Small shapes consistent with the module: batch=8, D_in=64, D_hidden=512 (module default).
    B, D_in, D_hidden = 8, 64, 512

    key = jax.random.PRNGKey(0)
    kx, kw, kb = jax.random.split(key, 3)

    bound = 1.0 / (D_in ** 0.5)
    x = jax.random.normal(kx, (B, D_in), dtype=jnp.float32)
    weight = jax.random.uniform(kw, (D_hidden, D_in), minval=-bound, maxval=bound,
                                dtype=jnp.float32)
    bias = jax.random.uniform(kb, (D_hidden,), minval=-bound, maxval=bound,
                              dtype=jnp.float32)

    # Hoisted once (transpose + bf16 cast) — NOT paid per forward call.
    w_t, b2 = prepare_mlp_params(weight, bias)

    out = mlp_forward(x, w_t, b2)
    out = jax.block_until_ready(out)

    # Reference with the same bf16 operand rounding / f32 accumulation as the MXU path.
    x_bf = x.astype(jnp.bfloat16).astype(jnp.float32)
    w_bf = weight.astype(jnp.bfloat16).astype(jnp.float32)
    ref = jnp.maximum(x_bf @ w_bf.T + bias, 0.0)

    assert out.shape == (B, D_hidden)
    assert out.dtype == jnp.float32
    assert jnp.allclose(out, ref, atol=1e-2, rtol=1e-2), float(jnp.max(jnp.abs(out - ref)))

    print("KERNEL_OK")
</pallas_src>

<mosaic_0001>
module attributes {stable_mosaic.version = 11 : i64} {
  func.func @_mlp_kernel(%arg0: i32, %arg1: i32, %arg2: i32, %arg3: memref<8x128xbf16, #tpu.memory_space<vmem>>, %arg4: memref<128x256xbf16, #tpu.memory_space<vmem>>, %arg5: memref<1x256xf32, #tpu.memory_space<vmem>>, %arg6: memref<8x256xf32, #tpu.memory_space<vmem>>, %arg7: memref<8x256xf32, #tpu.memory_space<vmem>>) attributes {dimension_semantics = [#tpu.dimension_semantics<parallel>, #tpu.dimension_semantics<parallel>, #tpu.dimension_semantics<arbitrary>], iteration_bounds = array<i64: 1, 2, 1>, scalar_prefetch = 0 : i64, scratch_operands = 1 : i64, tpu.core_type = #tpu.core_type<tc>, window_params = [{transform_indices = @transform_0, window_bounds = array<i64: 8, 128>}, {transform_indices = @transform_1, window_bounds = array<i64: 128, 256>}, {transform_indices = @transform_2, window_bounds = array<i64: 1, 256>}, {transform_indices = @transform_3, window_bounds = array<i64: 8, 256>}]} {
    %c0_i32 = arith.constant 0 : i32
    %0 = arith.cmpi eq, %arg2, %c0_i32 : i32
    %1 = arith.extui %0 : i1 to i32
    %c0_i32_0 = arith.constant 0 : i32
    %2 = arith.cmpi ne, %1, %c0_i32_0 : i32
    scf.if %2 {
      %cst_10 = arith.constant 0.000000e+00 : f32
      %12 = vector.broadcast %cst_10 : f32 to vector<8x256xf32>
      %c0_11 = arith.constant 0 : index
      %c0_12 = arith.constant 0 : index
      %13 = vector.load %arg7[%c0_11, %c0_12] : memref<8x256xf32, #tpu.memory_space<vmem>>, vector<8x256xf32>
      tpu.vector_store %arg7[%c0_11, %c0_12], %12 {strides = array<i32>} : memref<8x256xf32, #tpu.memory_space<vmem>>, vector<8x256xf32>,
    } else {
    }
    %c0 = arith.constant 0 : index
    %c0_1 = arith.constant 0 : index
    %3 = vector.load %arg7[%c0, %c0_1] : memref<8x256xf32, #tpu.memory_space<vmem>>, vector<8x256xf32>
    %c0_2 = arith.constant 0 : index
    %c0_3 = arith.constant 0 : index
    %4 = vector.load %arg3[%c0_2, %c0_3] : memref<8x128xbf16, #tpu.memory_space<vmem>>, vector<8x128xbf16>
    %c0_4 = arith.constant 0 : index
    %c0_5 = arith.constant 0 : index
    %5 = vector.load %arg4[%c0_4, %c0_5] : memref<128x256xbf16, #tpu.memory_space<vmem>>, vector<128x256xbf16>
    %cst = arith.constant dense<0.000000e+00> : vector<8x256xf32>
    %6 = tpu.matmul %4, %5, %cst {dimension_numbers = #tpu.dot_dimension_numbers<[1], [0], [0], [1], [0, 0, 1, 1], [], []>} : vector<8x128xbf16>, vector<128x256xbf16>, vector<8x256xf32> -> vector<8x256xf32>
    %7 = arith.addf %3, %6 : vector<8x256xf32>
    %c0_6 = arith.constant 0 : index
    %c0_7 = arith.constant 0 : index
    %8 = vector.load %arg7[%c0_6, %c0_7] : memref<8x256xf32, #tpu.memory_space<vmem>>, vector<8x256xf32>
    tpu.vector_store %arg7[%c0_6, %c0_7], %7 {strides = array<i32>} : memref<8x256xf32, #tpu.memory_space<vmem>>, vector<8x256xf32>,
    %c0_i32_8 = arith.constant 0 : i32
    %9 = arith.cmpi eq, %arg2, %c0_i32_8 : i32
    %10 = arith.extui %9 : i1 to i32
    %c0_i32_9 = arith.constant 0 : i32
    %11 = arith.cmpi ne, %10, %c0_i32_9 : i32
    scf.if %11 {
      %c0_10 = arith.constant 0 : index
      %c0_11 = arith.constant 0 : index
      %12 = vector.load %arg7[%c0_10, %c0_11] : memref<8x256xf32, #tpu.memory_space<vmem>>, vector<8x256xf32>
      %c0_12 = arith.constant 0 : index
      %c0_13 = arith.constant 0 : index
      %13 = vector.load %arg5[%c0_12, %c0_13] : memref<1x256xf32, #tpu.memory_space<vmem>>, vector<1x256xf32>
      %14 = vector.broadcast %13 : vector<1x256xf32> to vector<8x256xf32>
      %15 = arith.addf %12, %14 : vector<8x256xf32>
      %cst_14 = arith.constant 0.000000e+00 : f32
      %16 = vector.broadcast %cst_14 : f32 to vector<8x256xf32>
      %17 = arith.maximumf %15, %16 : vector<8x256xf32>
      %c0_15 = arith.constant 0 : index
      %c0_16 = arith.constant 0 : index
      %18 = vector.load %arg6[%c0_15, %c0_16] : memref<8x256xf32, #tpu.memory_space<vmem>>, vector<8x256xf32>
      tpu.vector_store %arg6[%c0_15, %c0_16], %17 {strides = array<i32>} : memref<8x256xf32, #tpu.memory_space<vmem>>, vector<8x256xf32>,
    } else {
    }
    return
  }
  func.func @transform_0(%arg0: i32, %arg1: i32, %arg2: i32) -> (i32, i32) {
    %c0_i32 = arith.constant 0 : i32
    return %arg0, %arg2 : i32, i32
  }
  func.func @transform_1(%arg0: i32, %arg1: i32, %arg2: i32) -> (i32, i32) {
    %c0_i32 = arith.constant 0 : i32
    return %arg2, %arg1 : i32, i32
  }
  func.func @transform_2(%arg0: i32, %arg1: i32, %arg2: i32) -> (i32, i32) {
    %c0_i32 = arith.constant 0 : i32
    %c0_i32_0 = arith.constant 0 : i32
    return %c0_i32, %arg1 : i32, i32
  }
  func.func @transform_3(%arg0: i32, %arg1: i32, %arg2: i32) -> (i32, i32) {
    %c0_i32 = arith.constant 0 : i32
    return %arg0, %arg1 : i32, i32
  }
}

</mosaic_0001>

<bundles_post_ra>
// kernel: mlp_forward.1
= control target key start
LH: loop header
LB: loop body
LE: loop exit
PB: predicated region body
PF: predicated region fallthrough
CT: control target
= control target key end

     0   :  { %8 = vsyncpa [#allocation5], 0  ;;  %s1041_s0 = inlined_call_operand.vmem [shape: bf16[8,128], index: 0, kind: input, shape index: {}]   ;;  %s1042_s1 = inlined_call_operand.vmem [shape: bf16[128,512], index: 1, kind: input, shape index: {}]   ;;  %s1043_s2 = inlined_call_operand.vmem [shape: f32[1,512], index: 2, kind: input, shape index: {}]   ;;  %s1044_s3 = inlined_call_operand.hbm [shape: f32[8,512], index: 3, kind: output, shape index: {}]  }
   0x1   :  { %10 = vsyncpa [#allocation5 + $0x1], 0  ;;  %s875_s12 = smov 0   ;;  %s877_s13 = smov 0  }
   0x2   :  { %s879_s14 = smov 0   ;;  %s881_s15 = smov 0  }
   0x3   :  { %s883_s16 = smov 0   ;;  %s885_s17 = smov 0  }
   0x4 LB: > { %s621_s18 = sadd.s32 4294967295, %s853_s17   ;;  %s622_s19 = sadd.s32 4294967294, %s853_s17   ;;  %s853_s17 = sphi %s885_s17, %s16_s17   ;;  %s849_s16 = sphi %s883_s16, %s1051_s16   ;;  %s845_s15 = sphi %s881_s15, %s1050_s15   ;;  %s841_s14 = sphi %s879_s14, %s1049_s14   ;;  %s837_s13 = sphi %s877_s13, %s1048_s13   ;;  %s833_s12 = sphi %s875_s12, %s1047_s12  }
   0x5   : > { %s31_s20 = sadd.s32 1, %s849_s16  ;;  %s72_s21 = sadd.s32 1, %s841_s14 }
   0x6   : > { %p33_p0 = scmp.ge.s32.totalorder %s31_s20, 2  ;;  %p79_p1 = scmp.ne.s32.totalorder %s841_s14, %s837_s13 }
   0x7   : > { %p80_p2 = scmp.eq.s32.totalorder %s853_s17, 0  ;;  %p137_p3 = scmp.eq.s32.totalorder %s621_s18, 1 }
   0x8   : > { %s1053_s20 = smov (%p33_p0, %s31_s20), 0  ;;  %p142_p6 = scmp.ne.s32.totalorder %s837_s13, %s833_s12 }
   0x9   : > { %p81_p4 = por %p80_p2, %p79_p1  ;;  %p914_p5 = por %p137_p3, %p79_p1 }
   0xa   : > { %s68_s23 = ssub.s32 %s849_s16, %s1053_s20  ;;  %p143_p8 = scmp.eq.s32.totalorder %s622_s19, 1 }
   0xb   : > { %p70_p7 = scmp.eq.s32.totalorder %s68_s23, 0  ;;  %p625_p10 = scmp.ge.s32.totalorder %s853_s17, 2 }
   0xc   : > { %p925_p9 = por %p143_p8, %p142_p6 }
   0xd   : > { %s923_s24 = scalar_select %p70_p7, %s841_s14, %s72_s21  }
   0xe   : > { %169 = sbr.rel (%p625_p10) target bundleno = 39 (0x27), region = 20 }
  0x13   : > { %172 = sbr.rel (!%p81_p4) target bundleno = 39 (0x27), region = 24  ;;  %s174_s26 = sand.u32 (%p81_p4), 1, %s841_s14  }
  0x14   : > { %s702_s27 = sshll.u32 (%p81_p4), %s849_s16, 3  ;;  %s626_s28 = sshll.u32 (%p81_p4), %s174_s26, 7 }
  0x15   : > { %s937_s4 = scalar_lea.vmem (%p81_p4), %s1042_s1, %s702_s27  ;;  %s176_s5 = scalar_lea.vmem (%p81_p4), [#allocation3], %s626_s28 }
  0x16   : > { %v241_v0 = vld [vmem:[%s937_s4] sm:$0xff] (%p81_p4)  ;;  %v243_v1 = vld [vmem:[%s937_s4 + $0x10] sm:$0xff] (%p81_p4) }
  0x17   : > { %v245_v2 = vld [vmem:[%s937_s4 + $0x20] sm:$0xff] (%p81_p4)  ;;  %242 = vst [vmem:[%s176_s5] sm:$0xff] (%p81_p4), %v241_v0  ;;  %v247_v3 = vld [vmem:[%s937_s4 + $0x30] sm:$0xff] (%p81_p4) }
  0x18   : > { %244 = vst [vmem:[%s176_s5 + $0x8] sm:$0xff] %v243_v1  ;;  %v249_v4 = vld [vmem:[%s937_s4 + $0x40] sm:$0xff]  ;;  %v251_v5 = vld [vmem:[%s937_s4 + $0x50] sm:$0xff] }
  0x19   : > { %246 = vst [vmem:[%s176_s5 + $0x10] sm:$0xff] %v245_v2  ;;  %v253_v6 = vld [vmem:[%s937_s4 + $0x60] sm:$0xff]  ;;  %v255_v7 = vld [vmem:[%s937_s4 + $0x70] sm:$0xff] }
  0x1a   : > { %248 = vst [vmem:[%s176_s5 + $0x18] sm:$0xff] %v247_v3  ;;  %v257_v8 = vld [vmem:[%s937_s4 + $0x80] sm:$0xff]  ;;  %v259_v9 = vld [vmem:[%s937_s4 + $0x90] sm:$0xff] }
  0x1b   : > { %250 = vst [vmem:[%s176_s5 + $0x20] sm:$0xff] %v249_v4  ;;  %v261_v10 = vld [vmem:[%s937_s4 + $0xa0] sm:$0xff]  ;;  %v263_v11 = vld [vmem:[%s937_s4 + $0xb0] sm:$0xff] }
  0x1c   : > { %252 = vst [vmem:[%s176_s5 + $0x28] sm:$0xff] %v251_v5  ;;  %v265_v12 = vld [vmem:[%s937_s4 + $0xc0] sm:$0xff]  ;;  %v267_v13 = vld [vmem:[%s937_s4 + $0xd0] sm:$0xff] }
  0x1d   : > { %254 = vst [vmem:[%s176_s5 + $0x30] sm:$0xff] %v253_v6  ;;  %v269_v14 = vld [vmem:[%s937_s4 + $0xe0] sm:$0xff]  ;;  %v271_v15 = vld [vmem:[%s937_s4 + $0xf0] sm:$0xff] }
  0x1e   : > { %256 = vst [vmem:[%s176_s5 + $0x38] sm:$0xff] %v255_v7 }
  0x1f   : > { %258 = vst [vmem:[%s176_s5 + $0x40] sm:$0xff] %v257_v8 }
  0x20   : > { %260 = vst [vmem:[%s176_s5 + $0x48] sm:$0xff] %v259_v9 }
  0x21   : > { %262 = vst [vmem:[%s176_s5 + $0x50] sm:$0xff] %v261_v10 }
  0x22   : > { %264 = vst [vmem:[%s176_s5 + $0x58] sm:$0xff] %v263_v11 }
  0x23   : > { %266 = vst [vmem:[%s176_s5 + $0x60] sm:$0xff] %v265_v12 }
  0x24   : > { %268 = vst [vmem:[%s176_s5 + $0x68] sm:$0xff] %v267_v13 }
  0x25   : > { %270 = vst [vmem:[%s176_s5 + $0x70] sm:$0xff] %v269_v14 }
  0x26   : > { %272 = vst [vmem:[%s176_s5 + $0x78] sm:$0xff] %v271_v15 }
  0x27 PF: > { %p629_p11 = scmp.ge.s32.totalorder %s853_s17, 1  ;;  %p285_p12 = scmp.lt.s32.totalorder %s853_s17, 3 }
  0x29   : > { %p286_p13 = pnand %p629_p11, %p285_p12 }
  0x2a   : > { %s958_s6 = sand.u32 (!%p286_p13), 1, %s837_s13   ;;  %s632_s11 = sshll.u32 (!%p286_p13), %s845_s15, 1 }
  0x2b   : > { %289 = sbr.rel (%p286_p13) target bundleno = 217 (0xd9), region = 66  ;;  %s630_s7 = sshll.u32 (!%p286_p13), %s958_s6, 7 }
  0x2c   : > { %s961_s8 = scalar_lea.vmem (!%p286_p13), [#allocation3], %s630_s7  ;;  %p336_p0 = scmp.lt.s32.totalorder (!%p286_p13), %s632_s11, 3 }
  0x2d   : > { %s631_s23 = sshll.u32 (!%p286_p13), %s958_s6, 4  ;;  %s719_s26 = sshll.u32 (!%p286_p13), %s845_s15, 4 }
  0x2e   : > { %s507_s29 = scalar_lea.hbm (!%p286_p13), %s1044_s3, %s719_s26  ;;  %s325_s30 = scalar_lea.vmem (!%p286_p13), [#allocation4], %s631_s23 }
  0x2f   : > { %s509_s4 = sshll.u32 (!%p286_p13), %s325_s30, 4  ;;  %s511_s5 = sshll.u32 (!%p286_p13), %s507_s29, 4  ;;  %s510_s4 = int_to_ptr.vmem [resolvable:$true] %s509_s4  ;;  %s512_s5 = int_to_ptr.hbm [resolvable:$true] %s511_s5 }
  0x30   : > { %v691_v16 = vld [vmem:[%s961_s8 + $0x70] sm:$0xf]  ;;  %v718_v17 = vld [vmem:[%s961_s8 + $0x74] sm:$0xf0]  ;;  %v717_v18 = vld [vmem:[%s961_s8 + $0x74] sm:$0xf] }
  0x31   : > { %v692_v19 = vor.u32 %v718_v17, %v691_v16  ;;  %v693_v20 = vld [vmem:[%s961_s8 + $0x78] sm:$0xf0]  ;;  %v683_v21 = vld [vmem:[%s961_s8 + $0x60] sm:$0xf]  ;;  %v716_v22 = vld [vmem:[%s961_s8 + $0x64] sm:$0xf0] }
  0x32   : > { %v696_v23 = vor.u32 %v717_v18, %v693_v20  ;;  %v715_v24 = vld [vmem:[%s961_s8 + $0x64] sm:$0xf]  ;;  %v685_v25 = vld [vmem:[%s961_s8 + $0x68] sm:$0xf0]  ;;  %v684_v26 = vor.u32 %v716_v22, %v683_v21  ;;  %v675_v28 = vld [vmem:[%s961_s8 + $0x50] sm:$0xf] }
  0x33   : > { %446 = vmatpush.bf16.msra.mxu0 %v692_v19  ;;  %v688_v27 = vor.u32 %v715_v24, %v685_v25  ;;  %v714_v29 = vld [vmem:[%s961_s8 + $0x54] sm:$0xf0]  ;;  %v713_v30 = vld [vmem:[%s961_s8 + $0x54] sm:$0xf]  ;;  %v677_v31 = vld [vmem:[%s961_s8 + $0x58] sm:$0xf0] }
  0x34   : > { %459 = vmatpush.bf16.msra.mxu1 %v696_v23  ;;  %v676_v32 = vor.u32 %v714_v29, %v675_v28  ;;  %v680_v33 = vor.u32 %v713_v30, %v677_v31  ;;  %v667_v34 = vld [vmem:[%s961_s8 + $0x40] sm:$0xf]  ;;  %v712_v35 = vld [vmem:[%s961_s8 + $0x44] sm:$0xf0]  ;;  %v711_v36 = vld [vmem:[%s961_s8 + $0x44] sm:$0xf] }
  0x35   : > { %v669_v37 = vld [vmem:[%s961_s8 + $0x48] sm:$0xf0]  ;;  %v668_v38 = vor.u32 %v712_v35, %v667_v34  ;;  %v659_v40 = vld [vmem:[%s961_s8 + $0x30] sm:$0xf]  ;;  %v710_v41 = vld [vmem:[%s961_s8 + $0x34] sm:$0xf0] }
  0x36   : > { %v672_v39 = vor.u32 %v711_v36, %v669_v37  ;;  %v709_v42 = vld [vmem:[%s961_s8 + $0x34] sm:$0xf]  ;;  %v661_v43 = vld [vmem:[%s961_s8 + $0x38] sm:$0xf0]  ;;  %v660_v44 = vor.u32 %v710_v41, %v659_v40  ;;  %v651_v46 = vld [vmem:[%s961_s8 + $0x20] sm:$0xf] }
  0x37   : > { %447 = vmatpush.bf16.msra.mxu0 %v684_v26  ;;  %v664_v45 = vor.u32 %v709_v42, %v661_v43  ;;  %v708_v47 = vld [vmem:[%s961_s8 + $0x24] sm:$0xf0]  ;;  %v707_v48 = vld [vmem:[%s961_s8 + $0x24] sm:$0xf]  ;;  %v653_v49 = vld [vmem:[%s961_s8 + $0x28] sm:$0xf0] }
  0x38   : > { %460 = vmatpush.bf16.msra.mxu1 %v688_v27  ;;  %v652_v50 = vor.u32 %v708_v47, %v651_v46  ;;  %v656_v51 = vor.u32 %v707_v48, %v653_v49  ;;  %v643_v52 = vld [vmem:[%s961_s8 + $0x10] sm:$0xf]  ;;  %v706_v53 = vld [vmem:[%s961_s8 + $0x14] sm:$0xf0]  ;;  %v705_v54 = vld [vmem:[%s961_s8 + $0x14] sm:$0xf] }
  0x39   : > { %v645_v55 = vld [vmem:[%s961_s8 + $0x18] sm:$0xf0]  ;;  %v644_v56 = vor.u32 %v706_v53, %v643_v52  ;;  %v635_v58 = vld [vmem:[%s961_s8] sm:$0xf]  ;;  %v704_v59 = vld [vmem:[%s961_s8 + $0x4] sm:$0xf0] }
  0x3a   : > { %v648_v57 = vor.u32 %v705_v54, %v645_v55  ;;  %v703_v60 = vld [vmem:[%s961_s8 + $0x4] sm:$0xf]  ;;  %v637_v61 = vld [vmem:[%s961_s8 + $0x8] sm:$0xf0]  ;;  %v636_v62 = vor.u32 %v704_v59, %v635_v58  ;;  %v349_v0 = vld [vmem:[%s1041_s0] sm:$0xf] }
  0x3b   : > { %448 = vmatpush.bf16.msra.mxu0 %v676_v32  ;;  %v640_v63 = vor.u32 %v703_v60, %v637_v61  ;;  %s1055_s11 = smov (!%p336_p0, %s632_s11), 3  ;;  %s494_s15 = scalar_lea.sflag [#allocation5], %s958_s6 }
  0x3c   : > { %461 = vmatpush.bf16.msra.mxu1 %v680_v33  ;;  %s338_s21 = scalar_lea.vmem %s1043_s2, %s1055_s11  ;;  %s789_s7 = sshra.s32 %s512_s5, 4  ;;  %s790_s7 = int_to_ptr.hbm [resolvable:$true] %s789_s7 }
  0x3d   : > { %v481_v1 = vld [vmem:[%s338_s21] sm:$0x3]  ;;  %s791_s8 = scalar_lea.hbm %s790_s7, 16  ;;  %s795_s11 = scalar_lea.hbm %s1044_s3, 32 }
  0x3e   : > { %v483_v2 = vperm.slane %v481_v1, 0  ;;  %v484_v3 = vperm.slane %v481_v1, 1  ;;  %p792_p1 = scmp.ne.s32.totalorder %s790_s7, %s791_s8  ;;  %p796_p4 = scmp.lt.s32.totalorder %s790_s7, %s1044_s3 }
  0x3f   : > { %449 = vmatpush.bf16.msra.mxu0 %v668_v38  ;;  %p797_p6 = scmp.lt.s32.totalorder %s795_s11, %s791_s8 }
  0x40   : > { %462 = vmatpush.bf16.msra.mxu1 %v672_v39  ;;  %p793_p2 = pnand %p792_p1, %p914_p5 }
  0x41   : > { %p798_p7 = por %p797_p6, %p796_p4 }
  0x42   : > { %p794_p3 = pneg %p793_p2 }
  0x43   : > { %450 = vmatpush.bf16.msra.mxu0 %v660_v44 }
  0x44   : > { %463 = vmatpush.bf16.msra.mxu1 %v664_v45  ;;  %p799_p8 = pnand %p798_p7, %p794_p3 }
  0x47   : > { %451 = vmatpush.bf16.msra.mxu0 %v652_v50 }
  0x48   : > { %464 = vmatpush.bf16.msra.mxu1 %v656_v51 }
  0x4b   : > { %452 = vmatpush.bf16.msra.mxu0 %v644_v56 }
  0x4c   : > { %465 = vmatpush.bf16.msra.mxu1 %v648_v57 }
  0x4f   : > { %453 = vmatpush.bf16.msra.mxu0 %v636_v62 }
  0x50   : > { %466 = vmatpush.bf16.msra.mxu1 %v640_v63 }
  0x52   : > { %454 = vmatmul.bf16.vlgmr.msra.gmra.mxu0 %v349_v0 }
  0x53   : > { %467 = vmatmul.bf16.vlgmr.msra.gmra.mxu1 %v349_v0 }
  0xcf   : > { %v455_v4 = vpop.f32.mrf.mxu0 }
  0xd0   : > { %v487_v5 = vadd.f32 %v483_v2, %v455_v4  ;;  %v468_v6 = vpop.f32.mrf.mxu1 }
  0xd1   : > { %v488_v7 = vadd.f32 %v484_v3, %v468_v6 }
  0xd2   : > { %v489_v8 = vmax.f32 %v487_v5, 0.0 }
  0xd3   : > { %v490_v9 = vmax.f32 %v488_v7, 0.0 }
  0xd4   : > { %491 = vst [vmem:[%s325_s30] sm:$0xff] %v489_v8 }
  0xd5   : > { %492 = vst [vmem:[%s325_s30 + $0x8] sm:$0xff] %v490_v9 }
  0xd6   : > { %802 = shalt.err (!%p799_p8)
}
  0xd7   : > { %720 = dma.vmem_to_hbm [thread:$0]  (%p914_p5), %s510_s4, 256, %s512_s5, %s494_s15   ;;  %v457_v10 = vpop.f32.mrf.mxu0 }
  0xd8   : > { %v470_v11 = vpop.f32.mrf.mxu1 }
  0xd9 PF: > { %s523_s6 = sand.u32 1, %s833_s12   ;;  %p723_p11 = pnand %p625_p10, %p925_p9 }
  0xda   : > { %s524_s21 = scalar_lea.sflag [#allocation5], %s523_s6 }
  0xdb   : > { %p724_p12 = pneg %p723_p11 }
  0xdd   : > { %828 = dma.done.wait (%p724_p12), %s524_s21, 256  }
  0xde   : > { %830 = vsyncadd (%p724_p12), %s524_s21, 4294967040  ;;  %s16_s17 = sadd.s32 1, %s853_s17   ;;  %s1047_s12 = smov %s837_s13 }
  0xdf   : > { %p13_p13 = scmp.ge.s32.totalorder %s16_s17, 4   ;;  %s1048_s13 = smov %s841_s14 }
  0xe0   : > { %s1049_s14 = smov %s923_s24  ;;  %s1050_s15 = smov %s849_s16 }
  0xe1   : > { %s1051_s16 = smov %s1053_s20  ;;  %15 = sbr.rel (!%p13_p13) target bundleno = 4 (0x4), region = 124 }
  0xe6   :  { %530 = vsyncpa [#allocation5], 1 }
  0xe7   :  { %532 = vsyncpa [#allocation5 + $0x1], 1 }

</bundles_post_ra>
